<compile_context>
chip_gen: v5e
topology: v5e:2x2
jax: 0.10.0
libtpu: 0.0.40
codegen_flags: <defaults>
</compile_context>

<pallas_src>
from functools import partial

import jax
import jax.numpy as jnp
from jax.experimental import pallas as pl
from jax.experimental.pallas import tpu as pltpu

WIDTH = 128  # fixed in the module (width = 128)

# SELU constants (match torch.nn.SELU / jax.nn.selu).
SELU_ALPHA = 1.6732632423543772848170429916717
SELU_SCALE = 1.0507009873554804934193349852946


def _nam_kernel(x_ref, a_ref, bs_ref, o_ref, *, matmul_dtype):
    # x_ref: (1, TN)  a_ref: (W, 1)  bs_ref: (C, W)  o_ref: (C, TN)
    z = x_ref[...] - a_ref[...]                                   # (W, TN)
    # Unscaled SELU on the VPU/EUP (SELU_SCALE is folded into bs in the
    # wrapper; where() keeps z for z > 0, so exp of large positive / garbage
    # padded lanes is never selected, and padded columns are write-masked).
    h = jnp.where(z > 0.0, z, SELU_ALPHA * (jnp.exp(z) - 1.0))    # (W, TN)
    # out^T = (SELU_SCALE * exp(A) * B)^T @ h^T : (C, W) @ (W, TN) -> (C, TN).
    o_ref[...] = jnp.dot(
        bs_ref[...].astype(matmul_dtype),
        h.astype(matmul_dtype),
        preferred_element_type=jnp.float32,
    )


def _round_up(v, m):
    return ((v + m - 1) // m) * m


def per_point_nam(x, a, A, B, *, tile_n=8192, matmul_dtype=jnp.float32):
    """x: (N,), a: (W,), A: (W,), B: (W, classes) -> (N, classes), f32."""
    n = x.shape[0]
    width = a.shape[0]
    assert width == WIDTH and A.shape == (width,) and B.shape[0] == width
    classes = B.shape[1]

    x2 = x.reshape(1, n).astype(jnp.float32)            # points on lanes
    a2 = a.reshape(width, 1).astype(jnp.float32)
    # Fold SELU_SCALE * exp(A) into B once (tiny (width, classes) op) and
    # transpose so the kernel writes a lane-dense (classes, tn) tile.
    bs = ((SELU_SCALE * jnp.exp(A.astype(jnp.float32)))[:, None]
          * B.astype(jnp.float32)).T                    # (classes, width)

    # Point-axis tile: full axis for small n; otherwise a multiple of 128 with
    # at least two grid steps (so both v7x TensorCores get work).
    if n <= 128:
        tn = n
    else:
        half = _round_up((n + 1) // 2, 128)
        tn = min(_round_up(tile_n, 128), half)
    grid = (pl.cdiv(n, tn),)   # partial trailing block is write-masked

    out_t = pl.pallas_call(
        partial(_nam_kernel, matmul_dtype=matmul_dtype),
        out_shape=jax.ShapeDtypeStruct((classes, n), jnp.float32),
        grid_spec=pltpu.PrefetchScalarGridSpec(
            num_scalar_prefetch=0,
            grid=grid,
            in_specs=[
                pl.BlockSpec((1, tn), lambda i: (0, i)),            # x row
                pl.BlockSpec((width, 1), lambda i: (0, 0)),         # a column
                pl.BlockSpec((classes, width), lambda i: (0, 0)),   # scaled B^T
            ],
            out_specs=pl.BlockSpec((classes, tn), lambda i: (0, i)),
        ),
        compiler_params=pltpu.CompilerParams(
            dimension_semantics=("parallel",),
            vmem_limit_bytes=32 * 1024 * 1024,
        ),
    )(x2, a2, bs)

    # Back to the module's (N, classes) convention (tiny (C, N) transpose).
    return out_t.T


def _reference(x, a, A, B):
    z = x.astype(jnp.float32)[:, None] - a.astype(jnp.float32)[None, :]
    h = jax.nn.selu(z) * jnp.exp(A.astype(jnp.float32))[None, :]
    return h @ B.astype(jnp.float32)


if __name__ == "__main__":
    key = jax.random.PRNGKey(0)
    kx, ka, kA, kB = jax.random.split(key, 4)

    N = 500          # points (deliberately not a multiple of 8/128)
    CLASSES = 10

    x = jax.random.normal(kx, (N,), dtype=jnp.float32)
    a = jax.random.normal(ka, (WIDTH,), dtype=jnp.float32)
    # Match the module's init for A: randn / 2 + 3.
    A = jax.random.normal(kA, (WIDTH,), dtype=jnp.float32) / 2.0 + 3.0
    # nn.Parameter B is zero-initialized in the module; use small random values
    # so the correctness check is non-trivial.
    B = 0.1 * jax.random.normal(kB, (WIDTH, CLASSES), dtype=jnp.float32)

    ref = _reference(x, a, A, B)

    # Default path: lane-dense tiles, grid of 2 (tn = 256 for N = 500).
    out = jax.block_until_ready(per_point_nam(x, a, A, B))
    assert out.shape == (N, CLASSES)
    assert jnp.allclose(out, ref, atol=2e-3, rtol=2e-3), "mismatch vs reference"

    # Small-tile path (grid of 4; exercises the masked partial trailing block).
    out_small = jax.block_until_ready(per_point_nam(x, a, A, B, tile_n=128))
    assert jnp.allclose(out_small, ref, atol=2e-3, rtol=2e-3), "mismatch (tiled)"

    # Single-block path (n <= 128: block covers the full point axis).
    out_tiny = jax.block_until_ready(per_point_nam(x[:100], a, A, B))
    assert jnp.allclose(out_tiny, ref[:100], atol=2e-3, rtol=2e-3), "mismatch (small n)"

    # Optional bf16 MXU operands (v6e/v7x fast path); f32 accumulation keeps
    # the error small, checked with a generous tolerance.
    out_bf16 = jax.block_until_ready(
        per_point_nam(x, a, A, B, matmul_dtype=jnp.bfloat16))
    assert jnp.allclose(out_bf16, ref, atol=1.0, rtol=1e-1), "mismatch (bf16)"

    print("KERNEL_OK")
</pallas_src>

<mosaic_0001>
module attributes {stable_mosaic.version = 11 : i64} {
  func.func @_nam_kernel(%arg0: i32, %arg1: memref<1x256xf32, #tpu.memory_space<vmem>>, %arg2: memref<128x1xf32, #tpu.memory_space<vmem>>, %arg3: memref<10x128xf32, #tpu.memory_space<vmem>>, %arg4: memref<10x256xf32, #tpu.memory_space<vmem>>) attributes {dimension_semantics = [#tpu.dimension_semantics<parallel>], iteration_bounds = array<i64: 2>, scalar_prefetch = 0 : i64, scratch_operands = 0 : i64, tpu.core_type = #tpu.core_type<tc>, window_params = [{transform_indices = @transform_0, window_bounds = array<i64: 1, 256>}, {pipeline_mode = #tpu.pipeline_mode<synchronous>, transform_indices = @transform_1, window_bounds = array<i64: 128, 1>}, {pipeline_mode = #tpu.pipeline_mode<synchronous>, transform_indices = @transform_2, window_bounds = array<i64: 10, 128>}, {transform_indices = @transform_3, window_bounds = array<i64: 10, 256>}]} {
    %c0 = arith.constant 0 : index
    %c0_0 = arith.constant 0 : index
    %0 = vector.load %arg1[%c0, %c0_0] : memref<1x256xf32, #tpu.memory_space<vmem>>, vector<1x256xf32>
    %c0_1 = arith.constant 0 : index
    %c0_2 = arith.constant 0 : index
    %1 = vector.load %arg2[%c0_1, %c0_2] : memref<128x1xf32, #tpu.memory_space<vmem>>, vector<128x1xf32>
    %2 = vector.broadcast %0 : vector<1x256xf32> to vector<128x256xf32>
    %3 = vector.broadcast %1 : vector<128x1xf32> to vector<128x256xf32>
    %4 = arith.subf %2, %3 : vector<128x256xf32>
    %cst = arith.constant 0.000000e+00 : f32
    %5 = vector.broadcast %cst : f32 to vector<128x256xf32>
    %6 = arith.cmpf ogt, %4, %5 : vector<128x256xf32>
    %7 = math.exp %4 : vector<128x256xf32>
    %cst_3 = arith.constant 1.000000e+00 : f32
    %8 = vector.broadcast %cst_3 : f32 to vector<128x256xf32>
    %9 = arith.subf %7, %8 : vector<128x256xf32>
    %cst_4 = arith.constant 1.67326319 : f32
    %10 = vector.broadcast %cst_4 : f32 to vector<128x256xf32>
    %11 = arith.mulf %10, %9 : vector<128x256xf32>
    %12 = arith.select %6, %4, %11 : vector<128x256xi1>, vector<128x256xf32>
    %c0_5 = arith.constant 0 : index
    %c0_6 = arith.constant 0 : index
    %13 = vector.load %arg3[%c0_5, %c0_6] : memref<10x128xf32, #tpu.memory_space<vmem>>, vector<10x128xf32>
    %cst_7 = arith.constant dense<0.000000e+00> : vector<10x256xf32>
    %14 = tpu.matmul %13, %12, %cst_7 {dimension_numbers = #tpu.dot_dimension_numbers<[1], [0], [0], [1], [0, 0, 1, 1], [], []>} : vector<10x128xf32>, vector<128x256xf32>, vector<10x256xf32> -> vector<10x256xf32>
    %c0_8 = arith.constant 0 : index
    %c0_9 = arith.constant 0 : index
    %15 = vector.load %arg4[%c0_8, %c0_9] : memref<10x256xf32, #tpu.memory_space<vmem>>, vector<10x256xf32>
    tpu.vector_store %arg4[%c0_8, %c0_9], %14 {strides = array<i32>} : memref<10x256xf32, #tpu.memory_space<vmem>>, vector<10x256xf32>,
    return
  }
  func.func @transform_0(%arg0: i32) -> (i32, i32) {
    %c0_i32 = arith.constant 0 : i32
    %c0_i32_0 = arith.constant 0 : i32
    return %c0_i32, %arg0 : i32, i32
  }
  func.func @transform_1(%arg0: i32) -> (i32, i32) {
    %c0_i32 = arith.constant 0 : i32
    %c0_i32_0 = arith.constant 0 : i32
    %c0_i32_1 = arith.constant 0 : i32
    return %c0_i32, %c0_i32_0 : i32, i32
  }
  func.func @transform_2(%arg0: i32) -> (i32, i32) {
    %c0_i32 = arith.constant 0 : i32
    %c0_i32_0 = arith.constant 0 : i32
    %c0_i32_1 = arith.constant 0 : i32
    return %c0_i32, %c0_i32_0 : i32, i32
  }
  func.func @transform_3(%arg0: i32) -> (i32, i32) {
    %c0_i32 = arith.constant 0 : i32
    %c0_i32_0 = arith.constant 0 : i32
    return %c0_i32, %arg0 : i32, i32
  }
}

</mosaic_0001>

<bundles_post_ra>
// kernel: tpu_custom_call.1
= control target key start
LH: loop header
LB: loop body
LE: loop exit
PB: predicated region body
PF: predicated region fallthrough
CT: control target
= control target key end

     0   :  { %8 = vsyncpa [#allocation3], 0  ;;  %s1281_s0 = inlined_call_operand.vmem [shape: f32[1,500], index: 0, kind: input, shape index: {}]   ;;  %s1282_s1 = inlined_call_operand.vmem [shape: f32[128,1], index: 1, kind: input, shape index: {}]   ;;  %s1283_s2 = inlined_call_operand.vmem [shape: f32[10,128], index: 2, kind: input, shape index: {}]   ;;  %s1284_s3 = inlined_call_operand.hbm [shape: f32[10,500], index: 3, kind: output, shape index: {}]  }
   0x1   :  { %10 = vsyncpa [#allocation3 + $0x1], 0  ;;  %s896_s12 = smov 0   ;;  %s898_s13 = smov 0  }
   0x2   :  { %s900_s14 = smov 0   ;;  %s902_s15 = smov 0  }
   0x3 LB: > { %s917_s16 = sadd.s32 4294967295, %s870_s15   ;;  %s622_s17 = sadd.s32 4294967294, %s870_s15   ;;  %s870_s15 = sphi %s902_s15, %s1290_s15   ;;  %s866_s14 = sphi %s900_s14, %s1289_s14   ;;  %s862_s13 = sphi %s898_s13, %s1288_s13   ;;  %s858_s12 = sphi %s896_s12, %s1287_s12  }
   0x4   : > { %s921_s18 = sadd.s32 1, %s870_s15   ;;  %s91_s19 = sadd.s32 1, %s866_s14 }
   0x5   : > { %s88_s20 = ssub.s32 %s870_s15, %s921_s18  ;;  %p101_p0 = scmp.ne.s32.totalorder %s866_s14, %s862_s13 }
   0x6   : > { %p89_p1 = scmp.eq.s32.totalorder %s88_s20, 0  ;;  %p102_p2 = scmp.eq.s32.totalorder %s917_s16, 1 }
   0x7   : > { %p107_p3 = scmp.ne.s32.totalorder %s862_s13, %s858_s12  ;;  %p108_p4 = scmp.eq.s32.totalorder %s622_s17, 1 }
   0x8   : > { %s932_s21 = scalar_select %p89_p1, %s866_s14, %s91_s19  }
   0x9   : > { %p934_p5 = por %p102_p2, %p101_p0  ;;  %p938_p6 = por %p108_p4, %p107_p3 }
   0xa   : > { %p625_p7 = scmp.ge.s32.totalorder %s870_s15, 1  ;;  %p140_p8 = scmp.lt.s32.totalorder %s870_s15, 3 }
   0xc   : > { %p141_p9 = pnand %p625_p7, %p140_p8 }
   0xd   : > { %s627_s11 = sshll.u32 (!%p141_p9), %s917_s16, 1  ;;  %s160_s28 = sand.u32 (!%p141_p9), 1, %s862_s13  }
   0xe   : > { %144 = sbr.rel (%p141_p9) target bundleno = 333 (0x14d), region = 32  ;;  %p164_p10 = scmp.lt.s32.totalorder (!%p141_p9), %s627_s11, 3 }
   0xf   : > { %s626_s29 = sshll.u32 (!%p141_p9), %s160_s28, 5  ;;  %s665_s30 = sshll.u32 (!%p141_p9), %s917_s16, 4 }
  0x10   : > { %s559_s6 = scalar_lea.hbm (!%p141_p9), %s1284_s3, %s665_s30  ;;  %s162_s7 = scalar_lea.vmem (!%p141_p9), [#allocation2], %s626_s29 }
  0x11   : > { %s560_s8 = sshll.u32 (!%p141_p9), %s162_s7, 4  ;;  %s562_s9 = sshll.u32 (!%p141_p9), %s559_s6, 4  ;;  %s561_s8 = int_to_ptr.vmem [resolvable:$true] %s560_s8  ;;  %s563_s9 = int_to_ptr.hbm [resolvable:$true] %s562_s9 }
  0x12   : > { %s548_s10 = scalar_lea.sflag (!%p141_p9), [#allocation3], %s160_s28  ;;  %s822_s16 = sshra.s32 (!%p141_p9), %s563_s9, 4  ;;  %s823_s16 = int_to_ptr.hbm [resolvable:$true] %s822_s16 }
  0x13   : > { %v185_v0 = vld [vmem:[%s1282_s1 + $0x78] sm:$0xff]  ;;  %v183_v1 = vld [vmem:[%s1282_s1 + $0x68] sm:$0xff]  ;;  %v872_v3 = vmov 0   ;;  %v182_v4 = vld [vmem:[%s1282_s1 + $0x60] sm:$0xff]  ;;  %s1292_s11 = smov (!%p164_p10, %s627_s11), 3  ;;  %p829_p0 = scmp.lt.s32.totalorder %s823_s16, %s1284_s3 }
  0x14   : > { %v181_v2 = vld [vmem:[%s1282_s1 + $0x58] sm:$0xff]  ;;  %743 = vset.pattern.permute.xlu2 %v872_v3  ;;  %742 = vset.pattern.permute.xlu1 %v872_v3  ;;  %v184_v5 = vld [vmem:[%s1282_s1 + $0x70] sm:$0xff]  ;;  %v178_v7 = vld [vmem:[%s1282_s1 + $0x40] sm:$0xff]  ;;  %s166_s20 = scalar_lea.vmem %s1281_s0, %s1292_s11  ;;  %s824_s11 = scalar_lea.hbm %s823_s16, 32 }
  0x15   : > { %741 = vset.pattern.permute.xlu0 %v872_v3  ;;  %258 = vperm.xlu1 %742, %v183_v1   ;;  %v180_v6 = vld [vmem:[%s1282_s1 + $0x50] sm:$0xff]  ;;  %v179_v8 = vld [vmem:[%s1282_s1 + $0x48] sm:$0xff]  ;;  %v177_v9 = vld [vmem:[%s1282_s1 + $0x38] sm:$0xff]  ;;  %p825_p11 = scmp.ne.s32.totalorder %s823_s16, %s824_s11 }
  0x16   : > { %268 = vperm.xlu0 %741, %v185_v0   ;;  %248 = vperm.xlu2 %743, %v181_v2   ;;  %v175_v10 = vld [vmem:[%s1282_s1 + $0x28] sm:$0xff]  ;;  %v176_v11 = vld [vmem:[%s1282_s1 + $0x30] sm:$0xff]  ;;  %v174_v12 = vld [vmem:[%s1282_s1 + $0x20] sm:$0xff] }
  0x17   : > { %v172_v13 = vld [vmem:[%s1282_s1 + $0x10] sm:$0xff]  ;;  %v173_v14 = vld [vmem:[%s1282_s1 + $0x18] sm:$0xff]  ;;  %v171_v15 = vld [vmem:[%s1282_s1 + $0x8] sm:$0xff]  ;;  %p826_p12 = pnand %p825_p11, %p934_p5 }
  0x18   : > { %v170_v16 = vld [vmem:[%s1282_s1] sm:$0xff] }
  0x19   : > { %v169_v17 = vld [vmem:[%s166_s20] sm:$0x3]  ;;  %p827_p13 = pneg %p826_p12  ;;  %s828_s20 = scalar_lea.hbm %s1284_s3, 64 }
  0x1a   : > { %v996_v19 = vperm.slane %v169_v17, 0  ;;  %v998_v20 = vperm.slane %v169_v17, 1  ;;  %p830_p1 = scmp.lt.s32.totalorder %s828_s20, %s824_s11 }
  0x1c   : > { %p831_p2 = por %p830_p1, %p829_p0 }
  0x1d   : > { %253 = vperm.xlu1 %742, %v182_v4  }
  0x1e   : > { %263 = vperm.xlu0 %741, %v184_v5   ;;  %243 = vperm.xlu2 %743, %v180_v6   ;;  %p832_p3 = pnand %p831_p2, %p827_p13 }
  0x25   : > { %233 = vperm.xlu1 %742, %v178_v7  }
  0x26   : > { %238 = vperm.xlu0 %741, %v179_v8   ;;  %228 = vperm.xlu2 %743, %v177_v9  }
  0x2d   : > { %218 = vperm.xlu1 %742, %v175_v10  }
  0x2e   : > { %223 = vperm.xlu0 %741, %v176_v11   ;;  %213 = vperm.xlu2 %743, %v174_v12  }
  0x35   : > { %203 = vperm.xlu1 %742, %v172_v13  }
  0x36   : > { %208 = vperm.xlu0 %741, %v173_v14   ;;  %198 = vperm.xlu2 %743, %v171_v15  }
  0x3e   : > { %193 = vperm.xlu0 %741, %v170_v16  }
  0x70   : > { %v249_v18 = vpop.permute.xlu2 %248 }
  0x71   : > { %v293_v21 = vsub.f32 %v996_v19, %v249_v18  ;;  %v294_v22 = vsub.f32 %v998_v20, %v249_v18 }
  0x73   : > { %v379_v23 = vmul.f32 1.442695, %v293_v21  ;;  %v381_v25 = vmul.f32 1.442695, %v294_v22  ;;  %vm325_vm0 = vcmp.gt.f32.partialorder %v293_v21, 0.0  ;;  %vm326_vm1 = vcmp.gt.f32.partialorder %v294_v22, 0.0 }
  0x75   : > { %744 = vpow2.f32 %v379_v23 }
  0x76   : > { %746 = vpow2.f32 %v381_v25 }
  0x78   : > { %v244_v24 = vpop.permute.xlu2 %243 }
  0x79   : > { %v1003_v26 = vsub.f32 %v996_v19, %v244_v24  ;;  %v1006_v27 = vsub.f32 %v998_v20, %v244_v24 }
  0x7b   : > { %v375_v28 = vmul.f32 1.442695, %v1003_v26  ;;  %v377_v30 = vmul.f32 1.442695, %v1006_v27  ;;  %v745_v33 = vpop.eup %744  ;;  %vm323_vm2 = vcmp.gt.f32.partialorder %v1003_v26, 0.0  ;;  %vm324_vm7 = vcmp.gt.f32.partialorder %v1006_v27, 0.0 }
  0x7c   : > { %v747_v34 = vpop.eup %746  ;;  %v650_v37 = vadd.f32 -1.0, %v745_v33 }
  0x7d   : > { %748 = vpow2.f32 %v375_v28  ;;  %v651_v38 = vadd.f32 -1.0, %v747_v34 }
  0x7e   : > { %750 = vpow2.f32 %v377_v30  ;;  %v453_v47 = vmul.f32 1.6732632, %v650_v37 }
  0x7f   : > { %v454_v48 = vmul.f32 1.6732632, %v651_v38 }
  0x80   : > { %v229_v29 = vpop.permute.xlu2 %228  ;;  %v1034_v59 = vsel %vm325_vm0, %v293_v21, %v453_v47 }
  0x81   : > { %v1011_v31 = vsub.f32 %v996_v19, %v229_v29  ;;  %v1014_v32 = vsub.f32 %v998_v20, %v229_v29  ;;  %v1036_v60 = vsel %vm326_vm1, %v294_v22, %v454_v48 }
  0x83   : > { %v363_v35 = vmul.f32 1.442695, %v1011_v31  ;;  %v365_v36 = vmul.f32 1.442695, %v1014_v32  ;;  %v749_v40 = vpop.eup %748  ;;  %vm317_vm8 = vcmp.gt.f32.partialorder %v1011_v31, 0.0  ;;  %vm318_vm10 = vcmp.gt.f32.partialorder %v1014_v32, 0.0 }
  0x84   : > { %v751_v49 = vpop.eup %750  ;;  %v648_v52 = vadd.f32 -1.0, %v749_v40 }
  0x85   : > { %752 = vpow2.f32 %v363_v35  ;;  %v649_v56 = vadd.f32 -1.0, %v751_v49 }
  0x86   : > { %754 = vpow2.f32 %v365_v36  ;;  %v451_v61 = vmul.f32 1.6732632, %v648_v52 }
  0x87   : > { %v259_v39 = vpop.permute.xlu1 %258  ;;  %v1058_v7 = vmul.f32 1.6732632, %v649_v56 }
  0x88   : > { %v269_v41 = vpop.permute.xlu0 %268  ;;  %v1019_v42 = vsub.f32 %v996_v19, %v259_v39  ;;  %v214_v43 = vpop.permute.xlu2 %213  ;;  %v1028_v46 = vsub.f32 %v998_v20, %v259_v39  ;;  %v1070_v18 = vsel %vm323_vm2, %v1003_v26, %v451_v61 }
  0x89   : > { %v1022_v44 = vsub.f32 %v996_v19, %v269_v41  ;;  %v1025_v45 = vsub.f32 %v998_v20, %v269_v41  ;;  %v1040_v62 = vsub.f32 %v996_v19, %v214_v43  ;;  %v1049_v3 = vsub.f32 %v998_v20, %v214_v43 }
  0x8a   : > { %v387_v53 = vmul.f32 1.442695, %v1019_v42  ;;  %v389_v54 = vmul.f32 1.442695, %v1028_v46  ;;  %vm329_vm5 = vcmp.gt.f32.partialorder %v1019_v42, 0.0  ;;  %vm330_vm6 = vcmp.gt.f32.partialorder %v1028_v46, 0.0 }
  0x8b   : > { %v395_v50 = vmul.f32 1.442695, %v1022_v44  ;;  %v397_v51 = vmul.f32 1.442695, %v1025_v45  ;;  %v753_v55 = vpop.eup %752  ;;  %v351_v16 = vmul.f32 1.442695, %v1040_v62 }
  0x8c   : > { %v755_v57 = vpop.eup %754  ;;  %v642_v8 = vadd.f32 -1.0, %v753_v55  ;;  %v353_v21 = vmul.f32 1.442695, %v1049_v3  ;;  %vm333_vm3 = vcmp.gt.f32.partialorder %v1022_v44, 0.0  ;;  %vm334_vm4 = vcmp.gt.f32.partialorder %v1025_v45, 0.0 }
  0x8d   : > { %756 = vpow2.f32 %v395_v50  ;;  %v643_v9 = vadd.f32 -1.0, %v755_v57 }
  0x8e   : > { %758 = vpow2.f32 %v397_v51  ;;  %v1075_v25 = vmul.f32 1.6732632, %v642_v8 }
  0x8f   : > { %v254_v58 = vpop.permute.xlu1 %253  ;;  %760 = vpow2.f32 %v387_v53  ;;  %v1078_v33 = vmul.f32 1.6732632, %v643_v9 }
  0x90   : > { %v264_v63 = vpop.permute.xlu0 %263  ;;  %v1043_v0 = vsub.f32 %v996_v19, %v254_v58  ;;  %v1046_v1 = vsub.f32 %v998_v20, %v254_v58  ;;  %v199_v2 = vpop.permute.xlu2 %198  ;;  %762 = vpow2.f32 %v389_v54 }
  0x91   : > { %v1052_v4 = vsub.f32 %v996_v19, %v264_v63  ;;  %v1055_v5 = vsub.f32 %v998_v20, %v264_v63  ;;  %v1064_v14 = vsub.f32 %v996_v19, %v199_v2  ;;  %v1081_v34 = vsub.f32 %v998_v20, %v199_v2 }
  0x92   : > { %v383_v6 = vmul.f32 1.442695, %v1043_v0  ;;  %v385_v13 = vmul.f32 1.442695, %v1046_v1  ;;  %vm327_vm9 = vcmp.gt.f32.partialorder %v1043_v0, 0.0  ;;  %vm328_vm13 = vcmp.gt.f32.partialorder %v1046_v1, 0.0 }
  0x93   : > { %v757_v10 = vpop.eup %756  ;;  %v391_v11 = vmul.f32 1.442695, %v1052_v4  ;;  %v393_v12 = vmul.f32 1.442695, %v1055_v5  ;;  %v339_v29 = vmul.f32 1.442695, %v1064_v14 }
  0x94   : > { %v759_v15 = vpop.eup %758  ;;  %764 = vpow2.f32 %v383_v6  ;;  %v658_v17 = vadd.f32 -1.0, %v757_v10  ;;  %v341_v56 = vmul.f32 1.442695, %v1081_v34  ;;  %vm331_vm11 = vcmp.gt.f32.partialorder %v1052_v4, 0.0 }
  0x95   : > { %766 = vpow2.f32 %v391_v11  ;;  %v659_v22 = vadd.f32 -1.0, %v759_v15  ;;  %v761_v23 = vpop.eup %760  ;;  %vm332_vm12 = vcmp.gt.f32.partialorder %v1055_v5, 0.0 }
  0x96   : > { %768 = vpow2.f32 %v393_v12  ;;  %v461_v24 = vmul.f32 1.6732632, %v658_v17  ;;  %v763_v28 = vpop.eup %762 }
  0x97   : > { %770 = vpow2.f32 %v385_v13  ;;  %v234_v30 = vpop.permute.xlu1 %233  ;;  %v462_v26 = vmul.f32 1.6732632, %v659_v22  ;;  %v655_v48 = vadd.f32 -1.0, %v763_v28 }
  0x98   : > { %v239_v35 = vpop.permute.xlu0 %238  ;;  %v1084_v36 = vsub.f32 %v996_v19, %v234_v30  ;;  %v1087_v37 = vsub.f32 %v998_v20, %v234_v30  ;;  %v493_v38 = vsel %vm333_vm3, %v1022_v44, %v461_v24  ;;  %772 = vpow2.f32 %v351_v16 }
  0x99   : > { %v1093_v39 = vsub.f32 %v996_v19, %v239_v35  ;;  %v1096_v40 = vsub.f32 %v998_v20, %v239_v35  ;;  %497 = vmatpush.msra.mxu0 %v493_v38  ;;  %666 = vmatpush.msra.mxu2 %v493_v38  ;;  %v494_v41 = vsel %vm334_vm4, %v1025_v45, %v462_v26  ;;  %774 = vpow2.f32 %v353_v21 }
  0x9a   : > { %v765_v43 = vpop.eup %764  ;;  %v367_v47 = vmul.f32 1.442695, %v1084_v36  ;;  %520 = vmatpush.msra.mxu1 %v494_v41  ;;  %682 = vmatpush.msra.mxu3 %v494_v41  ;;  %v654_v44 = vadd.f32 -1.0, %v761_v23  ;;  %776 = vpow2.f32 %v339_v29  ;;  %v369_v51 = vmul.f32 1.442695, %v1087_v37 }
  0x9b   : > { %v767_v49 = vpop.eup %766  ;;  %v371_v50 = vmul.f32 1.442695, %v1093_v39  ;;  %v373_v45 = vmul.f32 1.442695, %v1096_v40  ;;  %v652_v54 = vadd.f32 -1.0, %v765_v43  ;;  %vm321_vm14 = vcmp.gt.f32.partialorder %v1093_v39, 0.0 }
  0x9c   : > { %v769_v52 = vpop.eup %768  ;;  %778 = vpow2.f32 %v367_v47  ;;  %v656_v53 = vadd.f32 -1.0, %v767_v49  ;;  %v457_v61 = vmul.f32 1.6732632, %v654_v44  ;;  %v458_v9 = vmul.f32 1.6732632, %v655_v48 }
  0x9d   : > { %v771_v55 = vpop.eup %770  ;;  %780 = vpow2.f32 %v371_v50  ;;  %v657_v57 = vadd.f32 -1.0, %v769_v52  ;;  %v455_v16 = vmul.f32 1.6732632, %v652_v54  ;;  %vm322_vm15 = vcmp.gt.f32.partialorder %v1096_v40, 0.0 }
  0x9e   : > { %782 = vpow2.f32 %v373_v45  ;;  %v459_v58 = vmul.f32 1.6732632, %v656_v53  ;;  %v653_v63 = vadd.f32 -1.0, %v771_v55  ;;  %v1113_v2 = vpop.eup %772  ;;  %v490_v38 = vsel %vm330_vm6, %v1028_v46, %v458_v9 }
  0x9f   : > { %784 = vpow2.f32 %v369_v51  ;;  %v219_v6 = vpop.permute.xlu1 %218  ;;  %v460_v8 = vmul.f32 1.6732632, %v657_v57  ;;  %v1116_v10 = vpop.eup %774  ;;  %v484_v46 = vsel %vm324_vm7, %v1006_v27, %v1058_v7  ;;  %v477_v45 = vsel %vm317_vm8, %v1011_v31, %v1075_v25 }
  0xa0   : > { %v224_v11 = vpop.permute.xlu0 %223  ;;  %v1119_v12 = vsub.f32 %v996_v19, %v219_v6  ;;  %v1122_v13 = vsub.f32 %v998_v20, %v219_v6  ;;  %v491_v15 = vsel %vm331_vm11, %v1052_v4, %v459_v58  ;;  %v1127_v17 = vpop.eup %776  ;;  %v456_v24 = vmul.f32 1.6732632, %v653_v63 }
  0xa1   : > { %v1130_v21 = vsub.f32 %v996_v19, %v224_v11  ;;  %v1133_v22 = vsub.f32 %v998_v20, %v224_v11  ;;  %498 = vmatpush.msra.mxu0 %v491_v15  ;;  %667 = vmatpush.msra.mxu2 %v491_v15  ;;  %v492_v23 = vsel %vm332_vm12, %v1055_v5, %v460_v8  ;;  %786 = vpow2.f32 %v341_v56 }
  0xa2   : > { %v779_v28 = vpop.eup %778  ;;  %v355_v29 = vmul.f32 1.442695, %v1119_v12  ;;  %521 = vmatpush.msra.mxu1 %v492_v23  ;;  %683 = vmatpush.msra.mxu3 %v492_v23  ;;  %v489_v4 = vsel %vm329_vm5, %v1019_v42, %v457_v61  ;;  %v357_v5 = vmul.f32 1.442695, %v1122_v13  ;;  %v487_v42 = vsel %vm327_vm9, %v1043_v0, %v455_v16 }
  0xa3   : > { %v781_v30 = vpop.eup %780  ;;  %v359_v26 = vmul.f32 1.442695, %v1130_v21  ;;  %v361_v35 = vmul.f32 1.442695, %v1133_v22  ;;  %499 = vmatpush.msra.mxu0 %v489_v4  ;;  %668 = vmatpush.msra.mxu2 %v489_v4  ;;  %v644_v47 = vadd.f32 -1.0, %v779_v28  ;;  %v488_v48 = vsel %vm328_vm13, %v1046_v1, %v456_v24 }
  0xa4   : > { %v783_v41 = vpop.eup %782  ;;  %788 = vpow2.f32 %v355_v29  ;;  %522 = vmatpush.msra.mxu1 %v490_v38  ;;  %684 = vmatpush.msra.mxu3 %v490_v38  ;;  %v646_v43 = vadd.f32 -1.0, %v781_v30  ;;  %v478_v7 = vsel %vm318_vm10, %v1014_v32, %v1078_v33  ;;  %vm319_vm0 = vcmp.gt.f32.partialorder %v1084_v36, 0.0 }
  0xa5   : > { %v785_v44 = vpop.eup %784  ;;  %790 = vpow2.f32 %v359_v26  ;;  %500 = vmatpush.msra.mxu0 %v487_v42  ;;  %669 = vmatpush.msra.mxu2 %v487_v42  ;;  %v647_v49 = vadd.f32 -1.0, %v783_v41  ;;  %v447_v52 = vmul.f32 1.6732632, %v644_v47  ;;  %v636_v57 = vadd.f32 -1.0, %v1113_v2 }
  0xa6   : > { %792 = vpow2.f32 %v361_v35  ;;  %523 = vmatpush.msra.mxu1 %v488_v48  ;;  %685 = vmatpush.msra.mxu3 %v488_v48  ;;  %v449_v0 = vmul.f32 1.6732632, %v646_v43  ;;  %v645_v50 = vadd.f32 -1.0, %v785_v44  ;;  %vm320_vm1 = vcmp.gt.f32.partialorder %v1087_v37, 0.0 }
  0xa7   : > { %794 = vpow2.f32 %v357_v5  ;;  %501 = vmatpush.msra.mxu0 %v1034_v59  ;;  %670 = vmatpush.msra.mxu2 %v1034_v59  ;;  %v204_v1 = vpop.permute.xlu1 %203  ;;  %v450_v27 = vmul.f32 1.6732632, %v647_v49  ;;  %v1168_v51 = vpop.eup %786  ;;  %vm315_vm2 = vcmp.gt.f32.partialorder %v1130_v21, 0.0  ;;  %v439_v28 = vmul.f32 1.6732632, %v636_v57 }
  0xa8   : > { %524 = vmatpush.msra.mxu1 %v1036_v60  ;;  %686 = vmatpush.msra.mxu3 %v1036_v60  ;;  %v209_v31 = vpop.permute.xlu0 %208  ;;  %v1173_v25 = vsub.f32 %v996_v19, %v204_v1  ;;  %v1176_v59 = vsub.f32 %v998_v20, %v204_v1  ;;  %v448_v60 = vmul.f32 1.6732632, %v645_v50  ;;  %v481_v56 = vsel %vm321_vm14, %v1093_v39, %v449_v0 }
  0xa9   : > { %v1180_v53 = vsub.f32 %v996_v19, %v209_v31  ;;  %v1183_v32 = vsub.f32 %v998_v20, %v209_v31  ;;  %502 = vmatpush.msra.mxu0 %v1070_v18  ;;  %671 = vmatpush.msra.mxu2 %v1070_v18  ;;  %v482_v63 = vsel %vm322_vm15, %v1096_v40, %v450_v27  ;;  %v637_v40 = vadd.f32 -1.0, %v1116_v10 }
  0xaa   : > { %v789_v33 = vpop.eup %788  ;;  %v343_v54 = vmul.f32 1.442695, %v1173_v25  ;;  %v345_v55 = vmul.f32 1.442695, %v1176_v59  ;;  %525 = vmatpush.msra.mxu1 %v484_v46  ;;  %687 = vmatpush.msra.mxu3 %v484_v46  ;;  %v479_v39 = vsel %vm319_vm0, %v1084_v36, %v447_v52  ;;  %v480_v11 = vsel %vm320_vm1, %v1087_v37, %v448_v60 }
  0xab   : > { %v791_v58 = vpop.eup %790  ;;  %v347_v61 = vmul.f32 1.442695, %v1180_v53  ;;  %v349_v18 = vmul.f32 1.442695, %v1183_v32  ;;  %503 = vmatpush.msra.mxu0 %v481_v56  ;;  %672 = vmatpush.msra.mxu2 %v481_v56  ;;  %v638_v6 = vadd.f32 -1.0, %v789_v33  ;;  %vm316_vm3 = vcmp.gt.f32.partialorder %v1133_v22, 0.0 }
  0xac   : > { %v793_v8 = vpop.eup %792  ;;  %796 = vpow2.f32 %v343_v54  ;;  %526 = vmatpush.msra.mxu1 %v482_v63  ;;  %688 = vmatpush.msra.mxu3 %v482_v63  ;;  %v640_v2 = vadd.f32 -1.0, %v791_v58  ;;  %vm313_vm4 = vcmp.gt.f32.partialorder %v1119_v12, 0.0  ;;  %v440_v35 = vmul.f32 1.6732632, %v637_v40 }
  0xad   : > { %v795_v9 = vpop.eup %794  ;;  %798 = vpow2.f32 %v347_v61  ;;  %504 = vmatpush.msra.mxu0 %v479_v39  ;;  %673 = vmatpush.msra.mxu2 %v479_v39  ;;  %v641_v15 = vadd.f32 -1.0, %v793_v8  ;;  %v441_v23 = vmul.f32 1.6732632, %v638_v6  ;;  %vm314_vm5 = vcmp.gt.f32.partialorder %v1122_v13, 0.0 }
  0xae   : > { %800 = vpow2.f32 %v349_v18  ;;  %527 = vmatpush.msra.mxu1 %v480_v11  ;;  %689 = vmatpush.msra.mxu3 %v480_v11  ;;  %v443_v16 = vmul.f32 1.6732632, %v640_v2  ;;  %v639_v24 = vadd.f32 -1.0, %v795_v9  ;;  %vm311_vm6 = vcmp.gt.f32.partialorder %v1040_v62, 0.0 }
  0xaf   : > { %802 = vpow2.f32 %v345_v55  ;;  %505 = vmatpush.msra.mxu0 %v477_v45  ;;  %674 = vmatpush.msra.mxu2 %v477_v45  ;;  %v444_v36 = vmul.f32 1.6732632, %v641_v15  ;;  %v471_v43 = vsel %vm311_vm6, %v1040_v62, %v439_v28  ;;  %vm312_vm7 = vcmp.gt.f32.partialorder %v1049_v3, 0.0  ;;  %v495_v55 = vld [vmem:[%s1283_s2] sm:$0xff] }
  0xb0   : > { %528 = vmatpush.msra.mxu1 %v478_v7  ;;  %690 = vmatpush.msra.mxu3 %v478_v7  ;;  %v194_v29 = vpop.permute.xlu0 %193  ;;  %v475_v37 = vsel %vm315_vm2, %v1130_v21, %v443_v16  ;;  %v442_v10 = vmul.f32 1.6732632, %v639_v24  ;;  %v473_v21 = vsel %vm313_vm4, %v1119_v12, %v441_v23  ;;  %v630_v47 = vadd.f32 -1.0, %v1127_v17 }
  0xb1   : > { %v1210_v4 = vsub.f32 %v996_v19, %v194_v29  ;;  %v1213_v30 = vsub.f32 %v998_v20, %v194_v29  ;;  %506 = vmatpush.msra.mxu0 %v475_v37  ;;  %675 = vmatpush.msra.mxu2 %v475_v37  ;;  %v476_v26 = vsel %vm316_vm3, %v1133_v22, %v444_v36  ;;  %vm309_vm8 = vcmp.gt.f32.partialorder %v1180_v53, 0.0 }
  0xb2   : > { %v797_v5 = vpop.eup %796  ;;  %529 = vmatpush.msra.mxu1 %v476_v26  ;;  %691 = vmatpush.msra.mxu3 %v476_v26  ;;  %v474_v41 = vsel %vm314_vm5, %v1122_v13, %v442_v10  ;;  %v472_v48 = vsel %vm312_vm7, %v1049_v3, %v440_v35  ;;  %v631_v13 = vadd.f32 -1.0, %v1168_v51  ;;  %vm310_vm9 = vcmp.gt.f32.partialorder %v1183_v32, 0.0 }
  0xb3   : > { %v799_v38 = vpop.eup %798  ;;  %v335_v19 = vmul.f32 1.442695, %v1210_v4  ;;  %v337_v20 = vmul.f32 1.442695, %v1213_v30  ;;  %507 = vmatpush.msra.mxu0 %v473_v21  ;;  %676 = vmatpush.msra.mxu2 %v473_v21  ;;  %v632_v22 = vadd.f32 -1.0, %v797_v5  ;;  %vm307_vm10 = vcmp.gt.f32.partialorder %v1173_v25, 0.0 }
  0xb4   : > { %v801_v42 = vpop.eup %800  ;;  %530 = vmatpush.msra.mxu1 %v474_v41  ;;  %692 = vmatpush.msra.mxu3 %v474_v41  ;;  %v634_v12 = vadd.f32 -1.0, %v799_v38  ;;  %v433_v1 = vmul.f32 1.6732632, %v630_v47  ;;  %v434_v27 = vmul.f32 1.6732632, %v631_v13  ;;  %vm308_vm11 = vcmp.gt.f32.partialorder %v1176_v59, 0.0 }
  0xb5   : > { %v803_v44 = vpop.eup %802  ;;  %804 = vpow2.f32 %v335_v19  ;;  %508 = vmatpush.msra.mxu0 %v471_v43  ;;  %677 = vmatpush.msra.mxu2 %v471_v43  ;;  %v635_v46 = vadd.f32 -1.0, %v801_v42  ;;  %v435_v0 = vmul.f32 1.6732632, %v632_v22  ;;  %vm305_vm12 = vcmp.gt.f32.partialorder %v1064_v14, 0.0 }
  0xb6   : > { %806 = vpow2.f32 %v337_v20  ;;  %531 = vmatpush.msra.mxu1 %v472_v48  ;;  %693 = vmatpush.msra.mxu3 %v472_v48  ;;  %v437_v49 = vmul.f32 1.6732632, %v634_v12  ;;  %v633_v62 = vadd.f32 -1.0, %v803_v44  ;;  %vm306_vm13 = vcmp.gt.f32.partialorder %v1081_v34, 0.0 }
  0xb7   : > { %v438_v50 = vmul.f32 1.6732632, %v635_v46  ;;  %v467_v7 = vsel %vm307_vm10, %v1173_v25, %v435_v0  ;;  %v466_v25 = vsel %vm306_vm13, %v1081_v34, %v434_v27  ;;  %vm303_vm14 = vcmp.gt.f32.partialorder %v1210_v4, 0.0 }
  0xb8   : > { %v469_v17 = vsel %vm309_vm8, %v1180_v53, %v437_v49  ;;  %v436_v45 = vmul.f32 1.6732632, %v633_v62  ;;  %v465_v53 = vsel %vm305_vm12, %v1064_v14, %v433_v1  ;;  %vm304_vm15 = vcmp.gt.f32.partialorder %v1213_v30, 0.0  ;;  %v496_v14 = vld [vmem:[%s1283_s2 + $0x8] sm:$0x3] }
  0xb9   : > { %509 = vmatpush.msra.mxu0 %v469_v17  ;;  %678 = vmatpush.msra.mxu2 %v469_v17  ;;  %v470_v3 = vsel %vm310_vm9, %v1183_v32, %v438_v50 }
  0xba   : > { %532 = vmatpush.msra.mxu1 %v470_v3  ;;  %694 = vmatpush.msra.mxu3 %v470_v3  ;;  %v468_v31 = vsel %vm308_vm11, %v1176_v59, %v436_v45 }
  0xbb   : > { %v805_v51 = vpop.eup %804  ;;  %510 = vmatpush.msra.mxu0 %v467_v7  ;;  %679 = vmatpush.msra.mxu2 %v467_v7 }
  0xbc   : > { %v807_v52 = vpop.eup %806  ;;  %533 = vmatpush.msra.mxu1 %v468_v31  ;;  %695 = vmatpush.msra.mxu3 %v468_v31  ;;  %v628_v32 = vadd.f32 -1.0, %v805_v51 }
  0xbd   : > { %511 = vmatpush.msra.mxu0 %v465_v53  ;;  %680 = vmatpush.msra.mxu2 %v465_v53  ;;  %v629_v60 = vadd.f32 -1.0, %v807_v52 }
  0xbe   : > { %534 = vmatpush.msra.mxu1 %v466_v25  ;;  %696 = vmatpush.msra.mxu3 %v466_v25  ;;  %v431_v33 = vmul.f32 1.6732632, %v628_v32 }
  0xbf   : > { %v432_v59 = vmul.f32 1.6732632, %v629_v60 }
  0xc0   : > { %v463_v54 = vsel %vm303_vm14, %v1210_v4, %v431_v33 }
  0xc1   : > { %512 = vmatpush.msra.mxu0 %v463_v54  ;;  %681 = vmatpush.msra.mxu2 %v463_v54  ;;  %v464_v34 = vsel %vm304_vm15, %v1213_v30, %v432_v59 }
  0xc2   : > { %535 = vmatpush.msra.mxu1 %v464_v34  ;;  %697 = vmatpush.msra.mxu3 %v464_v34 }
  0xc3   : > { %516 = vmatmul.f32.vlgmr.msra.gmra.mxu2 %v496_v14  ;;  %539 = vmatmul.f32.vlgmr.msra.gmra.mxu3 %v496_v14 }
  0xc4   : > { %513 = vmatmul.f32.vlgmr.msra.gmra.mxu0 %v495_v55  ;;  %536 = vmatmul.f32.vlgmr.msra.gmra.mxu1 %v495_v55 }
 0x141   : > { %v514_v56 = vpop.f32.mrf.mxu0  ;;  %v537_v57 = vpop.f32.mrf.mxu1 }
 0x142   : > { %543 = vst [vmem:[%s162_s7] sm:$0xff] %v514_v56 }
 0x143   : > { %544 = vst [vmem:[%s162_s7 + $0x8] sm:$0xff] %v537_v57 }
 0x146   : > { %v517_v58 = vpop.f32.mrf.mxu2  ;;  %v540_v61 = vpop.f32.mrf.mxu3 }
 0x147   : > { %545 = vst [vmem:[%s162_s7 + $0x10] sm:$0x3] %v517_v58 }
 0x148   : > { %546 = vst [vmem:[%s162_s7 + $0x18] sm:$0x3] %v540_v61 }
 0x149   : > { %835 = shalt.err (!%p832_p3)
}
 0x14a   : > { %s873_s26 = smov 256   ;;  %s874_s27 = smov 512  }
 0x14b   : > { %s875_s28 = smov 16  }
 0x14c   : > { %698 = dma.vmem_to_hbm [thread:$0]  (%p934_p5), %s561_s8, 512, %s563_s9, %s548_s10, %s873_s26, %s874_s27, %s875_s28  }
 0x14d PF: > { %p704_p4 = scmp.ge.s32.totalorder %s870_s15, 2  ;;  %s577_s29 = sand.u32 1, %s858_s12  }
 0x14e   : > { %s578_s30 = scalar_lea.sflag [#allocation3], %s577_s29 }
 0x14f   : > { %p701_p7 = pnand %p704_p4, %p938_p6 }
 0x151   : > { %p702_p8 = pneg %p701_p7 }
 0x153   : > { %853 = dma.done.wait (%p702_p8), %s578_s30, 512  }
 0x154   : > { %855 = vsyncadd (%p702_p8), %s578_s30, 4294966784  ;;  %p13_p9 = scmp.ge.s32.totalorder %s921_s18, 4   ;;  %s1287_s12 = smov %s862_s13 }
 0x155   : > { %s1288_s13 = smov %s866_s14  ;;  %s1289_s14 = smov %s932_s21 }
 0x156   : > { %s1290_s15 = smov %s921_s18  ;;  %15 = sbr.rel (!%p13_p9) target bundleno = 3 (0x3), region = 67 }
 0x15b   :  { %584 = vsyncpa [#allocation3], 1 }
 0x15c   :  { %586 = vsyncpa [#allocation3 + $0x1], 1 }

</bundles_post_ra>
